<compile_context>
chip_gen: v7x
topology: tpu7x:2x2x1
jax: 0.10.0
libtpu: 0.0.40
codegen_flags: <defaults>
</compile_context>

<pallas_src>
import functools

import jax
import jax.numpy as jnp
from jax.experimental import pallas as pl
from jax.experimental.pallas import tpu as pltpu

EPS = 1e-5
LANE = 128
SUBLANE = 8
HALO = 128          # lane-granule halo block; supports kernel sizes K - 1 <= 128


def _round_up(x, m):
    return ((x + m - 1) // m) * m


def _masked_conv_tile(lens_ref, xm_ref, xh_ref, w_ref, *, tl, k, p, c8):
    """Shared tile body: input pre-mask + Conv1d, channels-on-sublanes layout.

    Returns (acc, length, base) where acc is the raw conv output (c8, tl) in f32
    (bias NOT included), length the valid sequence length of this batch row and
    base the tile's starting L position.
    """
    b = pl.program_id(0)
    li = pl.program_id(1)
    length = lens_ref[b]
    base = li * tl

    xm = xm_ref[0]                                     # (Cin, tl)   main window
    xh = xh_ref[0]                                     # (Cin, HALO) right halo
    win = jnp.concatenate([xm, xh], axis=-1)           # (Cin, tl + HALO)

    # ConvBN.pre_mask: padded column c maps to original index base + c - p;
    # zero positions with original index >= length (left/right zero-pad already 0).
    col = jax.lax.broadcasted_iota(jnp.int32, win.shape, 1)
    win = jnp.where(col + base < length + p, win, 0.0)

    # Conv1d as K lane-shifted (c8, Cin) x (Cin, tl) MXU dots (contraction is tiny;
    # this kernel is memory-bound, the shifts are static lane slices on the XLU).
    acc = jnp.zeros((c8, tl), jnp.float32)
    for j in range(k):
        acc = acc + jnp.dot(w_ref[j], win[:, j:j + tl],
                            preferred_element_type=jnp.float32)
    return acc, length, base


# ---------------------------------------------------------------------------
# Phase 1: pre-mask + conv + bias + BN pre-mask -> per-(b, tile) sum / sum^2
# ---------------------------------------------------------------------------
def _conv_stats_kernel(lens_ref, xm_ref, xh_ref, w_ref, bias_ref,
                       ssum_ref, ssq_ref, *, tl, k, p, c8):
    acc, length, base = _masked_conv_tile(lens_ref, xm_ref, xh_ref, w_ref,
                                          tl=tl, k=k, p=p, c8=c8)
    acc = acc + bias_ref[...]                                  # conv bias (c8, 1)

    # BatchNorm pre-mask (BN pre_mask=True when ConvBN post_mask=False).
    ocol = jax.lax.broadcasted_iota(jnp.int32, (c8, tl), 1)
    y = jnp.where(ocol + base < length, acc, 0.0)

    # Per-(batch, tile) partials; each grid step writes its own block, so both
    # grid axes stay "parallel" (megacore-friendly even at B=1).
    ssum_ref[0, 0] = jnp.sum(y, axis=-1, keepdims=True)        # (c8, 1)
    ssq_ref[0, 0] = jnp.sum(y * y, axis=-1, keepdims=True)     # (c8, 1)


# ---------------------------------------------------------------------------
# Phase 2: recompute conv, fused BN affine + BN post-mask + ReLU, NCW stores
# ---------------------------------------------------------------------------
def _conv_bn_relu_kernel(lens_ref, xm_ref, xh_ref, w_ref, scale_ref, shift_ref,
                         o_ref, *, tl, k, p, c8, cout):
    acc, length, base = _masked_conv_tile(lens_ref, xm_ref, xh_ref, w_ref,
                                          tl=tl, k=k, p=p, c8=c8)
    # Folded BN: z = (conv + bias - mean) * gamma * rsqrt(var + eps) + beta
    #              = conv * scale + shift     (bias folded into shift wrapper-side)
    z = acc * scale_ref[...] + shift_ref[...]
    ocol = jax.lax.broadcasted_iota(jnp.int32, (c8, tl), 1)
    z = jnp.where(ocol + base < length, z, 0.0)                # BN post-mask
    z = jnp.maximum(z, 0.0)                                    # ReLU
    # Dropout with cnn_keep_prob = 1.0 is identity.
    # TODO(synk): stochastic dropout (p > 0) would use pltpu.prng_random_bits here.
    o_ref[0] = z[:cout].astype(o_ref.dtype)                    # (Cout, tl), NCW


def conv_bn_forward(seq_ncl, mask, w_oik, bias, gamma, beta,
                    *, tile_l=2048, eps=EPS):
    """ConvBN.forward.  seq_ncl: (B, Cin, L) NCW float; mask: (B, L) 0/1 mask.
    Returns (B, Cout, L), matching the PyTorch module in training mode."""
    B, Cin, L = seq_ncl.shape
    Cout, _, K = w_oik.shape
    p = (K - 1) // 2
    if K - 1 > HALO:
        raise ValueError("kernel size too large for the fixed 128-lane halo")
    # TODO(synk): only contiguous prefix (length) masks are supported by this
    # optimized path (the mask is reconstructed in-kernel from per-row lengths).
    lengths = jnp.sum(mask.astype(jnp.int32), axis=1).astype(jnp.int32)   # (B,)
    try:  # guard (skipped when tracing): reject non-prefix masks explicitly
        prefix = jnp.arange(L)[None, :] < lengths[:, None]
        ok = bool(jnp.all(prefix == (mask != 0)))
    except Exception:
        ok = True
    if not ok:
        raise ValueError("conv_bn_forward: only contiguous prefix masks supported")

    c8 = _round_up(Cout, SUBLANE)                     # sublane-granule channel pad

    # Tile size: large lane tiles to amortize per-step overhead, clamped so the
    # double-buffered footprint stays well inside v7x's 64 MiB VMEM.
    max_tl = (16 * 2**20) // (32 * (Cin + c8 + 1))
    max_tl = max(LANE, (max_tl // LANE) * LANE)
    tl = max(LANE, min(_round_up(L, LANE), _round_up(tile_l, LANE), max_tl))
    nl = pl.cdiv(L, tl)
    l_r = nl * tl
    l_x = l_r + HALO                                  # padded input length

    # ---- layout glue (input already NCW -> only zero padding, no transpose) ----
    x_pad = jnp.pad(seq_ncl.astype(jnp.float32),
                    ((0, 0), (0, 0), (p, l_x - L - p)))        # (B, Cin, l_x)
    w_k = jnp.transpose(w_oik, (2, 0, 1)).astype(jnp.float32)  # (K, Cout, Cin)
    w_k = jnp.pad(w_k, ((0, 0), (0, c8 - Cout), (0, 0)))       # (K, c8, Cin)
    bias_p = jnp.pad(bias.astype(jnp.float32), (0, c8 - Cout)).reshape(c8, 1)

    grid = (B, nl)
    conv_flops = int(2 * B * l_r * K * Cin * c8)
    x_bytes = int(x_pad.size) * 4
    out_bytes = int(B * Cout * L * 4)

    vmem_need = 2 * (4 * (Cin * (tl + HALO) + K * c8 * Cin + 2 * c8)
                     + 4 * max(2 * c8, Cout * tl))
    vmem_limit = int(min(32 * 2**20, max(4 * 2**20, 4 * vmem_need)))

    # ---- phase 1: masked conv -> per-(batch, tile) BN statistic partials ----
    ssum, ssq = pl.pallas_call(
        functools.partial(_conv_stats_kernel, tl=tl, k=K, p=p, c8=c8),
        grid_spec=pltpu.PrefetchScalarGridSpec(
            num_scalar_prefetch=1,
            grid=grid,
            in_specs=[
                pl.BlockSpec((1, Cin, tl), lambda b, l, lens: (b, 0, l)),
                pl.BlockSpec((1, Cin, HALO),
                             lambda b, l, lens: (b, 0, (l + 1) * (tl // HALO))),
                pl.BlockSpec((K, c8, Cin), lambda b, l, lens: (0, 0, 0)),
                pl.BlockSpec((c8, 1), lambda b, l, lens: (0, 0)),
            ],
            out_specs=[
                pl.BlockSpec((1, 1, c8, 1), lambda b, l, lens: (b, l, 0, 0)),
                pl.BlockSpec((1, 1, c8, 1), lambda b, l, lens: (b, l, 0, 0)),
            ],
        ),
        out_shape=(
            jax.ShapeDtypeStruct((B, nl, c8, 1), jnp.float32),
            jax.ShapeDtypeStruct((B, nl, c8, 1), jnp.float32),
        ),
        compiler_params=pltpu.CompilerParams(
            dimension_semantics=("parallel", "parallel"),
            vmem_limit_bytes=vmem_limit,
        ),
        cost_estimate=pl.CostEstimate(flops=conv_flops, transcendentals=0,
                                      bytes_accessed=x_bytes + int(8 * B * nl * c8)),
    )(lengths, x_pad, x_pad, w_k, bias_p)

    # ---- tiny global BN statistics (train mode: biased variance over B*L) ----
    # NOTE: single-pass E[y^2]-E[y]^2 in f32; fine for activation-scale values.
    n = jnp.float32(B * L)
    total = jnp.sum(ssum, axis=(0, 1))                     # (c8, 1)
    total_sq = jnp.sum(ssq, axis=(0, 1))                   # (c8, 1)
    mean = total / n
    var = jnp.maximum(total_sq / n - mean * mean, 0.0)
    inv = jax.lax.rsqrt(var + eps)
    g_p = jnp.pad(gamma.astype(jnp.float32), (0, c8 - Cout)).reshape(c8, 1)
    be_p = jnp.pad(beta.astype(jnp.float32), (0, c8 - Cout)).reshape(c8, 1)
    scale = g_p * inv                                       # (c8, 1)
    shift = be_p + (bias_p - mean) * scale                  # conv bias folded in

    # ---- phase 2: recompute conv, fused affine + post-mask + ReLU, NCW output ----
    out = pl.pallas_call(
        functools.partial(_conv_bn_relu_kernel, tl=tl, k=K, p=p, c8=c8, cout=Cout),
        grid_spec=pltpu.PrefetchScalarGridSpec(
            num_scalar_prefetch=1,
            grid=grid,
            in_specs=[
                pl.BlockSpec((1, Cin, tl), lambda b, l, lens: (b, 0, l)),
                pl.BlockSpec((1, Cin, HALO),
                             lambda b, l, lens: (b, 0, (l + 1) * (tl // HALO))),
                pl.BlockSpec((K, c8, Cin), lambda b, l, lens: (0, 0, 0)),
                pl.BlockSpec((c8, 1), lambda b, l, lens: (0, 0)),
                pl.BlockSpec((c8, 1), lambda b, l, lens: (0, 0)),
            ],
            out_specs=pl.BlockSpec((1, Cout, tl), lambda b, l, lens: (b, 0, l)),
        ),
        out_shape=jax.ShapeDtypeStruct((B, Cout, L), jnp.float32),
        compiler_params=pltpu.CompilerParams(
            dimension_semantics=("parallel", "parallel"),
            vmem_limit_bytes=vmem_limit,
        ),
        cost_estimate=pl.CostEstimate(
            flops=conv_flops + int(4 * B * l_r * c8), transcendentals=0,
            bytes_accessed=x_bytes + out_bytes),
    )(lengths, x_pad, x_pad, w_k, scale, shift)

    return out                                              # (B, Cout, L)


def conv_bn_reference(seq_ncl, mask, w_oik, bias, gamma, beta):
    """Pure-JAX reference mirroring the PyTorch semantics (correctness check)."""
    K = w_oik.shape[2]
    p = (K - 1) // 2
    keep = (mask[:, None, :] == 1.0)                                 # (B, 1, L)
    x = jnp.where(keep, seq_ncl, 0.0)                                # pre_mask
    y = jax.lax.conv_general_dilated(
        x, w_oik, window_strides=(1,), padding=((p, p),),
        dimension_numbers=('NCH', 'OIH', 'NCH')) + bias[None, :, None]
    y = jnp.where(keep, y, 0.0)                                      # BN pre-mask
    mean = jnp.mean(y, axis=(0, 2), keepdims=True)
    var = jnp.mean((y - mean) ** 2, axis=(0, 2), keepdims=True)
    y = (y - mean) * jax.lax.rsqrt(var + EPS)
    y = y * gamma[None, :, None] + beta[None, :, None]
    y = jnp.where(keep, y, 0.0)                                      # BN post-mask
    return jnp.maximum(y, 0.0)                                       # ReLU (+identity dropout)


if __name__ == "__main__":
    B, Cin, Cout, L, K = 2, 4, 8, 16, 3

    key = jax.random.PRNGKey(0)
    k_x, k_w, k_b = jax.random.split(key, 3)

    seq = jax.random.normal(k_x, (B, Cin, L), dtype=jnp.float32)     # PyTorch NCW input
    # mask: 1 for valid positions, 0 for padded positions (ragged lengths)
    lengths = jnp.array([16, 10], dtype=jnp.int32)
    mask = (jnp.arange(L)[None, :] < lengths[:, None]).astype(jnp.float32)  # (B, L)

    # Deterministic parameters (PyTorch shapes: Conv1d weight (Cout, Cin, K), bias (Cout,))
    w = 0.1 * jax.random.normal(k_w, (Cout, Cin, K), dtype=jnp.float32)
    bias = 0.1 * jax.random.normal(k_b, (Cout,), dtype=jnp.float32)
    gamma = jnp.ones((Cout,), dtype=jnp.float32)                     # BN affine defaults
    beta = jnp.zeros((Cout,), dtype=jnp.float32)

    out = conv_bn_forward(seq, mask, w, bias, gamma, beta)
    out = jax.block_until_ready(out)

    ref = conv_bn_reference(seq, mask, w, bias, gamma, beta)
    assert out.shape == (B, Cout, L)
    err = float(jnp.max(jnp.abs(out - ref)))
    assert jnp.allclose(out, ref, atol=1e-4, rtol=1e-4), err

    print("KERNEL_OK")
</pallas_src>

<mosaic_0001>
module attributes {stable_mosaic.version = 11 : i64} {
  func.func @_conv_stats_kernel(%arg0: i32, %arg1: i32, %arg2: memref<2xi32, #tpu.memory_space<smem>>, %arg3: memref<1x4x128xf32, #tpu.memory_space<vmem>>, %arg4: memref<1x4x128xf32, #tpu.memory_space<vmem>>, %arg5: memref<3x8x4xf32, #tpu.memory_space<vmem>>, %arg6: memref<8x1xf32, #tpu.memory_space<vmem>>, %arg7: memref<1x1x8x1xf32, #tpu.memory_space<vmem>>, %arg8: memref<1x1x8x1xf32, #tpu.memory_space<vmem>>) attributes {dimension_semantics = [#tpu.dimension_semantics<parallel>, #tpu.dimension_semantics<parallel>], iteration_bounds = array<i64: 2, 1>, scalar_prefetch = 1 : i64, scratch_operands = 0 : i64, tpu.core_type = #tpu.core_type<tc>, window_params = [{transform_indices = @transform_0, window_bounds = array<i64: 1, 4, 128>}, {transform_indices = @transform_1, window_bounds = array<i64: 1, 4, 128>}, {pipeline_mode = #tpu.pipeline_mode<synchronous>, transform_indices = @transform_2, window_bounds = array<i64: 3, 8, 4>}, {pipeline_mode = #tpu.pipeline_mode<synchronous>, transform_indices = @transform_3, window_bounds = array<i64: 8, 1>}, {transform_indices = @transform_4, window_bounds = array<i64: 1, 1, 8, 1>}, {transform_indices = @transform_5, window_bounds = array<i64: 1, 1, 8, 1>}]} {
    %0 = arith.index_cast %arg0 : i32 to index
    %1 = memref.load %arg2[%0] : memref<2xi32, #tpu.memory_space<smem>>
    %c128_i32 = arith.constant 128 : i32
    %2 = arith.muli %arg1, %c128_i32 : i32
    %c0 = arith.constant 0 : index
    %c0_0 = arith.constant 0 : index
    %c0_1 = arith.constant 0 : index
    %3 = vector.load %arg3[%c0, %c0_0, %c0_1] : memref<1x4x128xf32, #tpu.memory_space<vmem>>, vector<1x4x128xf32>
    %4 = vector.shape_cast %3 : vector<1x4x128xf32> to vector<4x128xf32>
    %c0_2 = arith.constant 0 : index
    %c0_3 = arith.constant 0 : index
    %c0_4 = arith.constant 0 : index
    %5 = vector.load %arg4[%c0_2, %c0_3, %c0_4] : memref<1x4x128xf32, #tpu.memory_space<vmem>>, vector<1x4x128xf32>
    %6 = vector.shape_cast %5 : vector<1x4x128xf32> to vector<4x128xf32>
    %7 = tpu.concatenate %4, %6 in 1 : vector<4x128xf32>, vector<4x128xf32> -> vector<4x256xf32>
    %8 = tpu.iota {dimensions = array<i32: 1>} : vector<4x256xi32>
    %9 = vector.broadcast %2 : i32 to vector<4x256xi32>
    %10 = arith.addi %8, %9 : vector<4x256xi32>
    %c1_i32 = arith.constant 1 : i32
    %11 = arith.addi %1, %c1_i32 : i32
    %12 = vector.broadcast %11 : i32 to vector<4x256xi32>
    %13 = arith.cmpi slt, %10, %12 : vector<4x256xi32>
    %cst = arith.constant 0.000000e+00 : f32
    %14 = vector.broadcast %cst : f32 to vector<4x256xf32>
    %15 = arith.select %13, %7, %14 : vector<4x256xi1>, vector<4x256xf32>
    %cst_5 = arith.constant 0.000000e+00 : f32
    %16 = vector.broadcast %cst_5 : f32 to vector<8x128xf32>
    %c0_6 = arith.constant 0 : index
    %c0_7 = arith.constant 0 : index
    %c0_8 = arith.constant 0 : index
    %17 = vector.load %arg5[%c0_6, %c0_7, %c0_8] : memref<3x8x4xf32, #tpu.memory_space<vmem>>, vector<1x8x4xf32>
    %18 = vector.shape_cast %17 : vector<1x8x4xf32> to vector<8x4xf32>
    %19 = vector.extract_strided_slice %15 {offsets = [0, 0], sizes = [4, 128], strides = [1, 1]} : vector<4x256xf32> to vector<4x128xf32>
    %cst_9 = arith.constant dense<0.000000e+00> : vector<8x128xf32>
    %20 = tpu.matmul %18, %19, %cst_9 {dimension_numbers = #tpu.dot_dimension_numbers<[1], [0], [0], [1], [0, 0, 1, 1], [], []>} : vector<8x4xf32>, vector<4x128xf32>, vector<8x128xf32> -> vector<8x128xf32>
    %21 = arith.addf %16, %20 : vector<8x128xf32>
    %c1 = arith.constant 1 : index
    %c0_10 = arith.constant 0 : index
    %c0_11 = arith.constant 0 : index
    %22 = vector.load %arg5[%c1, %c0_10, %c0_11] : memref<3x8x4xf32, #tpu.memory_space<vmem>>, vector<1x8x4xf32>
    %23 = vector.shape_cast %22 : vector<1x8x4xf32> to vector<8x4xf32>
    %24 = vector.extract_strided_slice %15 {offsets = [0, 1], sizes = [4, 128], strides = [1, 1]} : vector<4x256xf32> to vector<4x128xf32>
    %cst_12 = arith.constant dense<0.000000e+00> : vector<8x128xf32>
    %25 = tpu.matmul %23, %24, %cst_12 {dimension_numbers = #tpu.dot_dimension_numbers<[1], [0], [0], [1], [0, 0, 1, 1], [], []>} : vector<8x4xf32>, vector<4x128xf32>, vector<8x128xf32> -> vector<8x128xf32>
    %26 = arith.addf %21, %25 : vector<8x128xf32>
    %c2 = arith.constant 2 : index
    %c0_13 = arith.constant 0 : index
    %c0_14 = arith.constant 0 : index
    %27 = vector.load %arg5[%c2, %c0_13, %c0_14] : memref<3x8x4xf32, #tpu.memory_space<vmem>>, vector<1x8x4xf32>
    %28 = vector.shape_cast %27 : vector<1x8x4xf32> to vector<8x4xf32>
    %29 = vector.extract_strided_slice %15 {offsets = [0, 2], sizes = [4, 128], strides = [1, 1]} : vector<4x256xf32> to vector<4x128xf32>
    %cst_15 = arith.constant dense<0.000000e+00> : vector<8x128xf32>
    %30 = tpu.matmul %28, %29, %cst_15 {dimension_numbers = #tpu.dot_dimension_numbers<[1], [0], [0], [1], [0, 0, 1, 1], [], []>} : vector<8x4xf32>, vector<4x128xf32>, vector<8x128xf32> -> vector<8x128xf32>
    %31 = arith.addf %26, %30 : vector<8x128xf32>
    %c0_16 = arith.constant 0 : index
    %c0_17 = arith.constant 0 : index
    %32 = vector.load %arg6[%c0_16, %c0_17] : memref<8x1xf32, #tpu.memory_space<vmem>>, vector<8x1xf32>
    %33 = vector.broadcast %32 : vector<8x1xf32> to vector<8x128xf32>
    %34 = arith.addf %31, %33 : vector<8x128xf32>
    %35 = tpu.iota {dimensions = array<i32: 1>} : vector<8x128xi32>
    %36 = vector.broadcast %2 : i32 to vector<8x128xi32>
    %37 = arith.addi %35, %36 : vector<8x128xi32>
    %38 = vector.broadcast %1 : i32 to vector<8x128xi32>
    %39 = arith.cmpi slt, %37, %38 : vector<8x128xi32>
    %cst_18 = arith.constant 0.000000e+00 : f32
    %40 = vector.broadcast %cst_18 : f32 to vector<8x128xf32>
    %41 = arith.select %39, %34, %40 : vector<8x128xi1>, vector<8x128xf32>
    %cst_19 = arith.constant dense<0.000000e+00> : vector<8xf32>
    %42 = vector.multi_reduction <add>, %41, %cst_19 [1] : vector<8x128xf32> to vector<8xf32>
    %43 = vector.shape_cast %42 : vector<8xf32> to vector<8x1xf32>
    %c0_20 = arith.constant 0 : index
    %c0_21 = arith.constant 0 : index
    %c0_22 = arith.constant 0 : index
    %c0_23 = arith.constant 0 : index
    %44 = vector.load %arg7[%c0_20, %c0_21, %c0_22, %c0_23] : memref<1x1x8x1xf32, #tpu.memory_space<vmem>>, vector<1x1x8x1xf32>
    %45 = vector.shape_cast %44 : vector<1x1x8x1xf32> to vector<8x1xf32>
    %46 = vector.shape_cast %43 : vector<8x1xf32> to vector<1x1x8x1xf32>
    tpu.vector_store %arg7[%c0_20, %c0_21, %c0_22, %c0_23], %46 {strides = array<i32>} : memref<1x1x8x1xf32, #tpu.memory_space<vmem>>, vector<1x1x8x1xf32>,
    %47 = arith.mulf %41, %41 : vector<8x128xf32>
    %cst_24 = arith.constant dense<0.000000e+00> : vector<8xf32>
    %48 = vector.multi_reduction <add>, %47, %cst_24 [1] : vector<8x128xf32> to vector<8xf32>
    %49 = vector.shape_cast %48 : vector<8xf32> to vector<8x1xf32>
    %c0_25 = arith.constant 0 : index
    %c0_26 = arith.constant 0 : index
    %c0_27 = arith.constant 0 : index
    %c0_28 = arith.constant 0 : index
    %50 = vector.load %arg8[%c0_25, %c0_26, %c0_27, %c0_28] : memref<1x1x8x1xf32, #tpu.memory_space<vmem>>, vector<1x1x8x1xf32>
    %51 = vector.shape_cast %50 : vector<1x1x8x1xf32> to vector<8x1xf32>
    %52 = vector.shape_cast %49 : vector<8x1xf32> to vector<1x1x8x1xf32>
    tpu.vector_store %arg8[%c0_25, %c0_26, %c0_27, %c0_28], %52 {strides = array<i32>} : memref<1x1x8x1xf32, #tpu.memory_space<vmem>>, vector<1x1x8x1xf32>,
    return
  }
  func.func @transform_0(%arg0: i32, %arg1: i32, %arg2: memref<2xi32, #tpu.memory_space<smem>>) -> (i32, i32, i32) {
    %c0_i32 = arith.constant 0 : i32
    %c0_i32_0 = arith.constant 0 : i32
    return %arg0, %c0_i32, %arg1 : i32, i32, i32
  }
  func.func @transform_1(%arg0: i32, %arg1: i32, %arg2: memref<2xi32, #tpu.memory_space<smem>>) -> (i32, i32, i32) {
    %c1_i32 = arith.constant 1 : i32
    %0 = arith.addi %arg1, %c1_i32 : i32
    %c1_i32_0 = arith.constant 1 : i32
    %1 = arith.muli %0, %c1_i32_0 : i32
    %c0_i32 = arith.constant 0 : i32
    %c0_i32_1 = arith.constant 0 : i32
    return %arg0, %c0_i32, %1 : i32, i32, i32
  }
  func.func @transform_2(%arg0: i32, %arg1: i32, %arg2: memref<2xi32, #tpu.memory_space<smem>>) -> (i32, i32, i32) {
    %c0_i32 = arith.constant 0 : i32
    %c0_i32_0 = arith.constant 0 : i32
    %c0_i32_1 = arith.constant 0 : i32
    %c0_i32_2 = arith.constant 0 : i32
    return %c0_i32, %c0_i32_0, %c0_i32_1 : i32, i32, i32
  }
  func.func @transform_3(%arg0: i32, %arg1: i32, %arg2: memref<2xi32, #tpu.memory_space<smem>>) -> (i32, i32) {
    %c0_i32 = arith.constant 0 : i32
    %c0_i32_0 = arith.constant 0 : i32
    %c0_i32_1 = arith.constant 0 : i32
    return %c0_i32, %c0_i32_0 : i32, i32
  }
  func.func @transform_4(%arg0: i32, %arg1: i32, %arg2: memref<2xi32, #tpu.memory_space<smem>>) -> (i32, i32, i32, i32) {
    %c0_i32 = arith.constant 0 : i32
    %c0_i32_0 = arith.constant 0 : i32
    %c0_i32_1 = arith.constant 0 : i32
    return %arg0, %arg1, %c0_i32, %c0_i32_0 : i32, i32, i32, i32
  }
  func.func @transform_5(%arg0: i32, %arg1: i32, %arg2: memref<2xi32, #tpu.memory_space<smem>>) -> (i32, i32, i32, i32) {
    %c0_i32 = arith.constant 0 : i32
    %c0_i32_0 = arith.constant 0 : i32
    %c0_i32_1 = arith.constant 0 : i32
    return %arg0, %arg1, %c0_i32, %c0_i32_0 : i32, i32, i32, i32
  }
}

</mosaic_0001>

<bundles_post_ra>
// kernel: tpu_custom_call.1
= control target key start
LH: loop header
LB: loop body
LE: loop exit
PB: predicated region body
PF: predicated region fallthrough
CT: control target
= control target key end

     0   :  { %s964_s0 = inlined_call_operand.vmem [shape: s32[2], index: 0, kind: input, shape index: {}]   ;;  %s965_s1 = inlined_call_operand.vmem [shape: f32[2,4,256], index: 1, kind: input, shape index: {}]   ;;  %s966_s2 = inlined_call_operand.vmem [shape: f32[2,4,256], index: 2, kind: input, shape index: {}]   ;;  %s967_s3 = inlined_call_operand.vmem [shape: f32[3,8,4], index: 3, kind: input, shape index: {}]   ;;  %s968_s4 = inlined_call_operand.vmem [shape: f32[8,1], index: 4, kind: input, shape index: {}]   ;;  %s969_s5 = inlined_call_operand.vmem [shape: f32[2,1,8,1], index: 5, kind: output, shape index: {0}]   ;;  %s970_s6 = inlined_call_operand.vmem [shape: f32[2,1,8,1], index: 6, kind: output, shape index: {1}]  }
   0x1   :  { %s12_s23 = sshll.u32 %s964_s0, 4  ;;  %s13_s23 = int_to_ptr.vmem [resolvable:$true] %s12_s23 }
   0x2   :  { %s812_s24 = scalar_lea.vmem %s13_s23, 16  ;;  %p817_p1 = scmp.lt.s32.totalorder %s13_s23, %s13_s23 }
   0x3   :  { %p813_p0 = scmp.ne.s32.totalorder %s13_s23, %s812_s24  ;;  %p818_p2 = scmp.lt.s32.totalorder %s812_s24, %s812_s24 }
   0x5   :  { %p819_p3 = por %p818_p2, %p817_p1 }
   0x7   :  { %p820_p4 = pnand %p819_p3, %p813_p0 }
   0x9   :  { %823 = shalt.err (!%p820_p4)  }
   0xa   :  { %s850_s25 = smov [#allocation3]  }
   0xb   :  { %15 = dma.vmem_to_smem %s13_s23, 16, %s850_s25, [#allocation2] }
   0xc   :  { %836 = dma.done.wait [#allocation2], 16 }
   0xd   :  { %837 = vsyncadd [#allocation2], 4294967280 }
   0xe   :  { %17 = sfence }
   0xf   :  { %s894_s26 = smov 0   ;;  %s896_s27 = smov 0  }
  0x10   :  { %s898_s28 = smov 0  }
  0x11 LB: > { %s35_s0 = sadd.s32 1, %s844_s27  ;;  %p739_p5 = scmp.ge.s32.totalorder %s848_s28, 1  ;;  %s848_s28 = sphi %s898_s28, %s23_s28   ;;  %s844_s27 = sphi %s896_s27, %s972_s27   ;;  %s840_s26 = sphi %s894_s26, %s971_s26  }
  0x12   : > { %p37_p6 = scmp.ge.s32.totalorder %s35_s0, 2  ;;  %p237_p7 = scmp.lt.s32.totalorder %s848_s28, 3 }
  0x14   : > { %s974_s0 = smov (%p37_p6, %s35_s0), 0  ;;  %p238_p8 = pnand %p739_p5, %p237_p7 }
  0x15   : > { %p286_p9 = scmp.lt.s32.totalorder (!%p238_p8), %s840_s26, 1  ;;  %s912_s29 = sld [smem:[#allocation3 + %s840_s26]] (!%p238_p8)  ;;  %v322_v0 = vlaneseq (!%p238_p8)  ;;  %v851_v1 = vmov (!%p238_p8), 0.0   ;;  %vm852_vm0 = vmmov (!%p238_p8), 0   ;;  %vm349_vm3 = vcmask (!%p238_p8), 1043456   ;;  %v334_v9 = vld [vmem:[%s967_s3] sm:$0xff] (!%p238_p8) }
  0x16   : > { %241 = sbr.rel (%p238_p8) target bundleno = 521 (0x209), region = 36  ;;  %766 = vmatprep.subr.mxu0 (!%p238_p8), %v851_v1  ;;  %771 = vmatprep.subr.mxu1 (!%p238_p8), %v851_v1  ;;  %v853_v7 = vmov (!%p238_p8), 0   ;;  %vm345_vm4 = vcmask (!%p238_p8), 31744   ;;  %s854_s17 = smov (!%p238_p8), 126   ;;  %v581_v11 = vld [vmem:[%s968_s4] sm:$0xff] (!%p238_p8)  ;;  %vm343_vm5 = vcmask (!%p238_p8), 1039360  }
  0x17   : > { %v323_v2 = vand.u32 (!%p238_p8), 127, %v322_v0  ;;  %768 = vmatprep.mubr.msk.f32.mxu0 (!%p238_p8), %vm852_vm0, %v851_v1  ;;  %773 = vmatprep.mubr.msk.f32.mxu1 (!%p238_p8), %vm852_vm0, %v851_v1  ;;  %s855_s18 = smov (!%p238_p8), 127   ;;  %vm503_vm6 = vcmask (!%p238_p8), 1031168   ;;  %v746_v16 = vld [vmem:[%s967_s3 + $0x8] sm:$0xff] (!%p238_p8)  ;;  %v751_v19 = vld [vmem:[%s967_s3 + $0x10] sm:$0xff] (!%p238_p8)  ;;  %vm593_vm8 = vcmask (!%p238_p8), 7168  }
  0x18   : > { %811 = vset.pattern.permute.xlu0 (!%p238_p8), %v853_v7 }
  0x19   : > { %v324_v3 = vadd.s32 (!%p238_p8), 128, %v323_v2 }
  0x1b   : > { %s328_s11 = sadd.s32 (!%p238_p8), 1, %s912_s29  ;;  %v588_v25 = vstv (!%p238_p8), %s912_s29 }
  0x1c   : > { %v329_v5 = vstv (!%p238_p8), %s328_s11  ;;  %vm589_vm7 = vcmp.lt.s32.totalorder (!%p238_p8), %v323_v2, %v588_v25 }
  0x1d   : > { %s976_s26 = smov (!%p286_p9, %s840_s26), 1  ;;  %vm330_vm1 = vcmp.lt.s32.totalorder %v323_v2, %v329_v5  ;;  %vm331_vm2 = vcmp.lt.s32.totalorder %v324_v3, %v329_v5 }
  0x1e   : > { %s916_s30 = sshll.u32 %s976_s26, 3 }
  0x1f   : > { %s293_s9 = scalar_lea.vmem %s965_s1, %s916_s30  ;;  %s758_s10 = sadd.s32 4, %s916_s30 }
  0x20   : > { %v320_v4 = vld [vmem:[%s293_s9] sm:$0xf]  ;;  %s302_s14 = scalar_lea.vmem %s966_s2, %s758_s10  ;;  %s310_s7 = scalar_lea.vmem %s969_s5, %s916_s30 }
  0x21   : > { %v321_v6 = vld [vmem:[%s302_s14] sm:$0xf]  ;;  %v332_v8 = vsel %vm330_vm1, %v320_v4, 0.0  ;;  %s317_s29 = scalar_lea.vmem %s970_s6, %s916_s30 }
  0x22   : > { %499 = vrot.lane.b32.xlu1 %v332_v8, %s854_s17  ;;  %339 = vrot.lane.b32.xlu0 %v332_v8, %s855_s18  ;;  %v333_v10 = vsel %vm331_vm2, %v321_v6, 0.0 }
  0x23   : > { %772 = vmatpush3.msk.msra.mxu1 %vm349_vm3, %v332_v8 }
  0x24   : > { %774 = vmatmul.mubr.msk.f32.vlgmr.msra.gmra.mrb[0].mxu1 %vm345_vm4, %v334_v9 }
  0x26   : > { %501 = vrot.lane.b32.xlu1 %v333_v10, %s854_s17  ;;  %341 = vrot.lane.b32.xlu0 %v333_v10, %s855_s18 }
  0x2a   : > { %584 = vperm.xlu0 %811, %v581_v11  }
  0x94   : > { %v500_v12 = vpop.permute.xlu1 %499  ;;  %v340_v13 = vpop.permute.xlu0 %339 }
  0x98   : > { %v502_v14 = vpop.permute.xlu1 %501  ;;  %v342_v15 = vpop.permute.xlu0 %341 }
  0x99   : > { %v344_v17 = vsel %vm343_vm5, %v340_v13, %v342_v15  ;;  %v504_v18 = vsel %vm503_vm6, %v500_v12, %v502_v14 }
  0x9a   : > { %767 = vmatpush3.msk.msra.mxu0 %vm349_vm3, %v344_v17 }
  0x9b   : > { %769 = vmatmul.mubr.msk.f32.vlgmr.msra.gmra.mrb[0].mxu0 %vm345_vm4, %v746_v16  ;;  %776 = vmatprep.subr.mxu0 %v851_v1 }
  0x9c   : > { %777 = vmatpush3.msk.msra.mxu0 %vm349_vm3, %v504_v18  ;;  %778 = vmatprep.mubr.msk.f32.mxu0 %vm852_vm0, %v851_v1 }
  0x9f   : > { %779 = vmatmul.mubr.msk.f32.vlgmr.msra.gmra.mrb[2].mxu0 %vm345_vm4, %v751_v19 }
  0xa9   : > { %v585_v27 = vpop.permute.xlu0 %584 }
  0xf7   : > { %v493_v20 = vpop.f32.mrb[0].mxu1 }
  0xf8   : > { %v775_v21 = vpop.f32.mrb[1].mxu1 }
 0x16e   : > { %v418_v22 = vpop.f32.mrb[0].mxu0 }
 0x16f   : > { %v770_v23 = vpop.f32.mrb[1].mxu0  ;;  %v494_v24 = vadd.f32 %v493_v20, %v418_v22 }
 0x172   : > { %v576_v26 = vpop.f32.mrb[2].mxu0 }
 0x173   : > { %v580_v28 = vadd.f32 %v576_v26, %v494_v24  ;;  %v780_v29 = vpop.f32.mrb[3].mxu0 }
 0x175   : > { %v587_v30 = vadd.f32 %v585_v27, %v580_v28 }
 0x177   : > { %v590_v31 = vsel %vm589_vm7, %v587_v30, 0.0 }
 0x178   : > { %591 = vadd.xlane.f32.xlu1 %v590_v31  ;;  %v595_v32 = vmul.f32 %v590_v31, %v590_v31 }
 0x17a   : > { %596 = vadd.xlane.f32.xlu0 %v595_v32 }
 0x205   : > { %v592_v33 = vpop.xlane.xlu1 %591 }
 0x206   : > { %594 = vst.msk [vmem:[%s310_s7] sm:$0xff] %vm593_vm8, %v592_v33 }
 0x207   : > { %v597_v34 = vpop.xlane.xlu0 %596 }
 0x208   : > { %598 = vst.msk [vmem:[%s317_s29] sm:$0xff] %vm593_vm8, %v597_v34 }
 0x209 PF: > { %s23_s28 = sadd.s32 1, %s848_s28   ;;  %s971_s26 = smov %s844_s27 }
 0x20a   : > { %p20_p10 = scmp.ge.s32.totalorder %s23_s28, 4   ;;  %s972_s27 = smov %s974_s0 }
 0x20c   :  { %22 = sbr.rel (!%p20_p10) target bundleno = 17 (0x11), region = 83 }

</bundles_post_ra>
